<compile_context>
chip_gen: v6e
topology: v6e:2x2x1
jax: 0.10.0
libtpu: 0.0.40
codegen_flags: <defaults>
</compile_context>

<pallas_src>
import functools

import jax
import jax.numpy as jnp
from jax.experimental import pallas as pl
from jax.experimental.pallas import tpu as pltpu


def _round_up(x, m):
    return ((x + m - 1) // m) * m


def _default_align():
    # v6e/v7x MXUs are 2x256x256 -> pad feature dims to 256 for full tiles;
    # v5e (4x128x128) and older only need 128.
    try:
        kind = jax.devices()[0].device_kind.lower()
    except Exception:
        return 256
    for tag in ("v2", "v3", "v4", "v5"):
        if tag in kind:
            return 128
    return 256


def _vmem_capacity_bytes():
    try:
        return int(pltpu.get_tpu_info().vmem_capacity_bytes)
    except Exception:
        return 64 << 20  # conservative (v7x per-TC size)


def _resident_spec(shape):
    # Constant index_map -> DMA'd once, VMEM-resident across the row grid.
    # Single-buffer it (default pipelining would allocate 2 copies).
    try:
        return pl.BlockSpec(shape, lambda i: (0, 0), pipeline_mode=pl.Buffered(1))
    except (TypeError, AttributeError):
        return pl.BlockSpec(shape, lambda i: (0, 0))


def prepare_ff_params(w1, b1, w2, b2, *, param_dtype=jnp.bfloat16, align=None):
    """One-time parameter prep (call OUTSIDE the hot path).

    PyTorch nn.Linear layout in: w1 (hidden, dim), b1 (hidden,),
    w2 (dim, hidden), b2 (dim,). Returns weights transposed to (in, out)
    row-major, cast to `param_dtype`, zero-padded to MXU-aligned feature dims.
    """
    hidden, dim = w1.shape
    assert w2.shape == (dim, hidden)
    if align is None:
        align = _default_align()
    dim_p = _round_up(dim, align)
    hid_p = _round_up(hidden, align)
    if param_dtype is not None:
        w1, b1, w2, b2 = (jnp.asarray(t, param_dtype) for t in (w1, b1, w2, b2))
    w1t = jnp.zeros((dim_p, hid_p), w1.dtype).at[:dim, :hidden].set(w1.T)
    w2t = jnp.zeros((hid_p, dim_p), w2.dtype).at[:hidden, :dim].set(w2.T)
    b1p = jnp.zeros((1, hid_p), b1.dtype).at[0, :hidden].set(b1)
    b2p = jnp.zeros((1, dim_p), b2.dtype).at[0, :dim].set(b2)
    return w1t, b1p, w2t, b2p, dim, hidden


def _ff_kernel(x_ref, w1_ref, b1_ref, w2_ref, b2_ref, o_ref, acc_ref, *,
               n_chunks, th):
    # x_ref:  (tm, dim_p)     w1_ref: (dim_p, hid_p)   b1_ref: (1, hid_p)
    # w2_ref: (hid_p, dim_p)  b2_ref: (1, dim_p)       o_ref:  (tm, dim_p)
    # acc_ref: (tm, dim_p) f32 scratch.
    x = x_ref[...]
    # Fold the second bias into the accumulator init (saves one VPU pass).
    acc_ref[...] = jnp.broadcast_to(b2_ref[...].astype(jnp.float32),
                                    acc_ref.shape)

    def chunk(off):
        h = jnp.dot(x, w1_ref[:, pl.ds(off, th)],
                    preferred_element_type=jnp.float32)
        h = jnp.maximum(h + b1_ref[:, pl.ds(off, th)].astype(jnp.float32), 0.0)
        acc_ref[...] += jnp.dot(h.astype(w2_ref.dtype),
                                w2_ref[pl.ds(off, th), :],
                                preferred_element_type=jnp.float32)

    if n_chunks <= 4:
        # Few chunks: static slices (zero-cost views), fully unrolled.
        for k in range(n_chunks):
            chunk(k * th)
    else:
        @pl.loop(0, n_chunks)
        def _(k):
            chunk(pl.multiple_of(k * th, th))

    o_ref[...] = acc_ref[...].astype(o_ref.dtype)


def shai_position_wise_ff(x, w1t, b1p, w2t, b2p, *, dim=None, tm_target=512,
                          hidden_chunk_target=512):
    """x: [batch, seq, dim]; parameters from prepare_ff_params."""
    batch, seq, dim_in = x.shape
    dim = dim_in if dim is None else dim
    assert dim == dim_in
    dim_p, hid_p = w1t.shape
    assert w2t.shape == (hid_p, dim_p)

    cdtype = w1t.dtype                 # MXU compute dtype (bf16 by default)
    out_dtype = x.dtype
    csz = jnp.dtype(cdtype).itemsize
    osz = jnp.dtype(out_dtype).itemsize
    wsz = csz

    # Hidden chunk size (inside the kernel): multiple of 128, divides hid_p.
    th = min(hid_p, max(128, hidden_chunk_target))
    while hid_p % th != 0:
        th -= 128
    n_chunks = hid_p // th

    n = batch * seq
    # Row tile aligned to the packed-vreg height of the compute dtype
    # (8 rows for f32, 16 for bf16, 32 for int8/fp8).
    sub = 8 * (4 // csz)
    tm = min(tm_target, _round_up(n, sub))
    tm = _round_up(tm, sub)

    cap = _vmem_capacity_bytes()
    budget = int(cap * 0.85)           # leave XLA / Mosaic headroom

    def vmem_need(tm_):
        return (2 * tm_ * dim_p * csz          # x tiles (double-buffered)
                + 2 * tm_ * dim_p * osz        # out tiles (double-buffered)
                + dim_p * hid_p * wsz          # w1 resident (Buffered(1))
                + hid_p * dim_p * wsz          # w2 resident (Buffered(1))
                + 2 * (hid_p + dim_p) * wsz    # biases
                + tm_ * dim_p * 4              # f32 accumulator scratch
                + tm_ * th * 4                 # f32 h chunk
                + tm_ * th * csz)              # bf16 copy of h for 2nd matmul

    while tm > sub and vmem_need(tm) > budget:
        tm = max(sub, _round_up(tm // 2, sub))

    n_p = _round_up(n, tm)
    grid = (n_p // tm,)

    x2d = x.reshape(n, dim).astype(cdtype)
    pad_rows, pad_cols = n_p - n, dim_p - dim
    if pad_rows or pad_cols:
        x2d = jnp.pad(x2d, ((0, pad_rows), (0, pad_cols)))

    flops = 4 * n_p * dim_p * hid_p
    bytes_accessed = (n_p * dim_p * csz
                      + 2 * dim_p * hid_p * wsz
                      + (hid_p + dim_p) * wsz
                      + n_p * dim_p * osz)

    vmem_limit = int(min(max(vmem_need(tm) * 1.25 + (2 << 20), 32 << 20),
                         budget))

    kernel = functools.partial(_ff_kernel, n_chunks=n_chunks, th=th)

    out2d = pl.pallas_call(
        kernel,
        out_shape=jax.ShapeDtypeStruct((n_p, dim_p), out_dtype),
        grid_spec=pltpu.PrefetchScalarGridSpec(
            num_scalar_prefetch=0,
            grid=grid,
            in_specs=[
                pl.BlockSpec((tm, dim_p), lambda i: (i, 0)),
                _resident_spec((dim_p, hid_p)),   # w1
                _resident_spec((1, hid_p)),       # b1
                _resident_spec((hid_p, dim_p)),   # w2
                _resident_spec((1, dim_p)),       # b2
            ],
            out_specs=pl.BlockSpec((tm, dim_p), lambda i: (i, 0)),
            scratch_shapes=[pltpu.VMEM((tm, dim_p), jnp.float32)],
        ),
        compiler_params=pltpu.CompilerParams(
            dimension_semantics=("parallel",),
            vmem_limit_bytes=vmem_limit),
        cost_estimate=pl.CostEstimate(
            flops=flops, transcendentals=0, bytes_accessed=bytes_accessed),
    )(x2d, w1t, b1p, w2t, b2p)

    if pad_rows or pad_cols:
        out2d = out2d[:n, :dim]
    return out2d.reshape(batch, seq, dim)


if __name__ == "__main__":
    batch, seq, dim, hidden = 2, 8, 32, 64

    key = jax.random.PRNGKey(0)
    kx, kw1, kb1, kw2, kb2, kx2 = jax.random.split(key, 6)

    x = jax.random.normal(kx, (batch, seq, dim), dtype=jnp.float32)

    # PyTorch nn.Linear parameter layout: W is (out_features, in_features).
    w1 = jax.random.normal(kw1, (hidden, dim), dtype=jnp.float32) * 0.1
    b1 = jax.random.normal(kb1, (hidden,), dtype=jnp.float32) * 0.1
    w2 = jax.random.normal(kw2, (dim, hidden), dtype=jnp.float32) * 0.1
    b2 = jax.random.normal(kb2, (dim,), dtype=jnp.float32) * 0.1

    ref = jnp.maximum(x @ w1.T + b1, 0.0) @ w2.T + b2

    # One-time parameter prep (outside the hot path): bf16, transposed, padded.
    w1t, b1p, w2t, b2p, dim_, hidden_ = prepare_ff_params(w1, b1, w2, b2)

    out = jax.block_until_ready(
        shai_position_wise_ff(x, w1t, b1p, w2t, b2p, dim=dim_))
    assert out.shape == (batch, seq, dim)
    assert out.dtype == x.dtype
    # bf16 weights/activations on the MXU (f32 accumulate) -> loosened tolerance.
    assert jnp.allclose(out, ref, atol=2e-2, rtol=2e-2), (
        "mismatch vs reference, max abs diff %e"
        % float(jnp.max(jnp.abs(out - ref))))

    # Ragged row count -> exercises the padded-rows path.
    x_odd = jax.random.normal(kx2, (3, 5, dim), dtype=jnp.float32)
    out_odd = jax.block_until_ready(
        shai_position_wise_ff(x_odd, w1t, b1p, w2t, b2p, dim=dim_))
    ref_odd = jnp.maximum(x_odd @ w1.T + b1, 0.0) @ w2.T + b2
    assert out_odd.shape == (3, 5, dim)
    assert jnp.allclose(out_odd, ref_odd, atol=2e-2, rtol=2e-2), "odd-row mismatch"

    # f32 parameter path (debug / high-precision) still matches tightly.
    w1f, b1f, w2f, b2f, _, _ = prepare_ff_params(
        w1, b1, w2, b2, param_dtype=jnp.float32)
    out_f32 = jax.block_until_ready(
        shai_position_wise_ff(x, w1f, b1f, w2f, b2f, dim=dim_))
    assert jnp.allclose(out_f32, ref, atol=1e-5, rtol=1e-5), "f32 path mismatch"

    print("KERNEL_OK")
</pallas_src>

<mosaic_0001>
module attributes {stable_mosaic.version = 11 : i64} {
  func.func @_ff_kernel(%arg0: i32, %arg1: memref<16x256xbf16, #tpu.memory_space<vmem>>, %arg2: memref<256x256xbf16, #tpu.memory_space<vmem>>, %arg3: memref<1x256xbf16, #tpu.memory_space<vmem>>, %arg4: memref<256x256xbf16, #tpu.memory_space<vmem>>, %arg5: memref<1x256xbf16, #tpu.memory_space<vmem>>, %arg6: memref<16x256xf32, #tpu.memory_space<vmem>>, %arg7: memref<16x256xf32, #tpu.memory_space<vmem>>) attributes {dimension_semantics = [#tpu.dimension_semantics<parallel>], iteration_bounds = array<i64: 1>, scalar_prefetch = 0 : i64, scratch_operands = 1 : i64, tpu.core_type = #tpu.core_type<tc>, window_params = [{transform_indices = @transform_0, window_bounds = array<i64: 16, 256>}, {pipeline_mode = #tpu.pipeline_mode<synchronous>, transform_indices = @transform_1, window_bounds = array<i64: 256, 256>}, {pipeline_mode = #tpu.pipeline_mode<synchronous>, transform_indices = @transform_2, window_bounds = array<i64: 1, 256>}, {pipeline_mode = #tpu.pipeline_mode<synchronous>, transform_indices = @transform_3, window_bounds = array<i64: 256, 256>}, {pipeline_mode = #tpu.pipeline_mode<synchronous>, transform_indices = @transform_4, window_bounds = array<i64: 1, 256>}, {transform_indices = @transform_5, window_bounds = array<i64: 16, 256>}]} {
    %c0 = arith.constant 0 : index
    %c0_0 = arith.constant 0 : index
    %0 = vector.load %arg1[%c0, %c0_0] : memref<16x256xbf16, #tpu.memory_space<vmem>>, vector<16x256xbf16>
    %c0_1 = arith.constant 0 : index
    %c0_2 = arith.constant 0 : index
    %1 = vector.load %arg5[%c0_1, %c0_2] : memref<1x256xbf16, #tpu.memory_space<vmem>>, vector<1x256xbf16>
    %2 = arith.extf %1 : vector<1x256xbf16> to vector<1x256xf32>
    %3 = vector.shape_cast %2 : vector<1x256xf32> to vector<1x256xf32>
    %4 = vector.broadcast %3 : vector<1x256xf32> to vector<16x256xf32>
    %c0_3 = arith.constant 0 : index
    %c0_4 = arith.constant 0 : index
    %5 = vector.load %arg7[%c0_3, %c0_4] : memref<16x256xf32, #tpu.memory_space<vmem>>, vector<16x256xf32>
    tpu.vector_store %arg7[%c0_3, %c0_4], %4 {strides = array<i32>} : memref<16x256xf32, #tpu.memory_space<vmem>>, vector<16x256xf32>,
    %c0_5 = arith.constant 0 : index
    %c0_6 = arith.constant 0 : index
    %6 = vector.load %arg2[%c0_5, %c0_6] : memref<256x256xbf16, #tpu.memory_space<vmem>>, vector<256x256xbf16>
    %cst = arith.constant dense<0.000000e+00> : vector<16x256xf32>
    %7 = tpu.matmul %0, %6, %cst {dimension_numbers = #tpu.dot_dimension_numbers<[1], [0], [0], [1], [0, 0, 1, 1], [], []>} : vector<16x256xbf16>, vector<256x256xbf16>, vector<16x256xf32> -> vector<16x256xf32>
    %c0_7 = arith.constant 0 : index
    %c0_8 = arith.constant 0 : index
    %8 = vector.load %arg3[%c0_7, %c0_8] : memref<1x256xbf16, #tpu.memory_space<vmem>>, vector<1x256xbf16>
    %9 = arith.extf %8 : vector<1x256xbf16> to vector<1x256xf32>
    %10 = vector.broadcast %9 : vector<1x256xf32> to vector<16x256xf32>
    %11 = arith.addf %7, %10 : vector<16x256xf32>
    %cst_9 = arith.constant 0.000000e+00 : f32
    %12 = vector.broadcast %cst_9 : f32 to vector<16x256xf32>
    %13 = arith.maximumf %11, %12 : vector<16x256xf32>
    %c0_10 = arith.constant 0 : index
    %c0_11 = arith.constant 0 : index
    %14 = vector.load %arg7[%c0_10, %c0_11] : memref<16x256xf32, #tpu.memory_space<vmem>>, vector<16x256xf32>
    %15 = arith.truncf %13 : vector<16x256xf32> to vector<16x256xbf16>
    %c0_12 = arith.constant 0 : index
    %c0_13 = arith.constant 0 : index
    %16 = vector.load %arg4[%c0_12, %c0_13] : memref<256x256xbf16, #tpu.memory_space<vmem>>, vector<256x256xbf16>
    %cst_14 = arith.constant dense<0.000000e+00> : vector<16x256xf32>
    %17 = tpu.matmul %15, %16, %cst_14 {dimension_numbers = #tpu.dot_dimension_numbers<[1], [0], [0], [1], [0, 0, 1, 1], [], []>} : vector<16x256xbf16>, vector<256x256xbf16>, vector<16x256xf32> -> vector<16x256xf32>
    %18 = arith.addf %14, %17 : vector<16x256xf32>
    %c0_15 = arith.constant 0 : index
    %c0_16 = arith.constant 0 : index
    %19 = vector.load %arg7[%c0_15, %c0_16] : memref<16x256xf32, #tpu.memory_space<vmem>>, vector<16x256xf32>
    tpu.vector_store %arg7[%c0_15, %c0_16], %18 {strides = array<i32>} : memref<16x256xf32, #tpu.memory_space<vmem>>, vector<16x256xf32>,
    %c0_17 = arith.constant 0 : index
    %c0_18 = arith.constant 0 : index
    %20 = vector.load %arg7[%c0_17, %c0_18] : memref<16x256xf32, #tpu.memory_space<vmem>>, vector<16x256xf32>
    %c0_19 = arith.constant 0 : index
    %c0_20 = arith.constant 0 : index
    %21 = vector.load %arg6[%c0_19, %c0_20] : memref<16x256xf32, #tpu.memory_space<vmem>>, vector<16x256xf32>
    tpu.vector_store %arg6[%c0_19, %c0_20], %20 {strides = array<i32>} : memref<16x256xf32, #tpu.memory_space<vmem>>, vector<16x256xf32>,
    return
  }
  func.func @transform_0(%arg0: i32) -> (i32, i32) {
    %c0_i32 = arith.constant 0 : i32
    %c0_i32_0 = arith.constant 0 : i32
    return %arg0, %c0_i32 : i32, i32
  }
  func.func @transform_1(%arg0: i32) -> (i32, i32) {
    %c0_i32 = arith.constant 0 : i32
    %c0_i32_0 = arith.constant 0 : i32
    %c0_i32_1 = arith.constant 0 : i32
    return %c0_i32, %c0_i32_0 : i32, i32
  }
  func.func @transform_2(%arg0: i32) -> (i32, i32) {
    %c0_i32 = arith.constant 0 : i32
    %c0_i32_0 = arith.constant 0 : i32
    %c0_i32_1 = arith.constant 0 : i32
    return %c0_i32, %c0_i32_0 : i32, i32
  }
  func.func @transform_3(%arg0: i32) -> (i32, i32) {
    %c0_i32 = arith.constant 0 : i32
    %c0_i32_0 = arith.constant 0 : i32
    %c0_i32_1 = arith.constant 0 : i32
    return %c0_i32, %c0_i32_0 : i32, i32
  }
  func.func @transform_4(%arg0: i32) -> (i32, i32) {
    %c0_i32 = arith.constant 0 : i32
    %c0_i32_0 = arith.constant 0 : i32
    %c0_i32_1 = arith.constant 0 : i32
    return %c0_i32, %c0_i32_0 : i32, i32
  }
  func.func @transform_5(%arg0: i32) -> (i32, i32) {
    %c0_i32 = arith.constant 0 : i32
    %c0_i32_0 = arith.constant 0 : i32
    return %arg0, %c0_i32 : i32, i32
  }
}

</mosaic_0001>

<bundles_post_ra>
// kernel: tpu_custom_call.1
= control target key start
LH: loop header
LB: loop body
LE: loop exit
PB: predicated region body
PF: predicated region fallthrough
CT: control target
= control target key end

     0   :  { %10 = vsyncpa [#allocation4], 0  ;;  %s949_s0 = inlined_call_operand.hbm [shape: bf16[16,256], index: 0, kind: input, shape index: {}]   ;;  %s950_s1 = inlined_call_operand.hbm [shape: bf16[256,256], index: 1, kind: input, shape index: {}]   ;;  %s951_s2 = inlined_call_operand.vmem [shape: bf16[1,256], index: 2, kind: input, shape index: {}]   ;;  %s952_s3 = inlined_call_operand.hbm [shape: bf16[256,256], index: 3, kind: input, shape index: {}]   ;;  %s953_s4 = inlined_call_operand.vmem [shape: bf16[1,256], index: 4, kind: input, shape index: {}]   ;;  %s954_s5 = inlined_call_operand.hbm [shape: f32[16,256], index: 5, kind: output, shape index: {}]  }
   0x1   :  { %11 = vsyncpa [#allocation7], 0 }
   0x2   :  { %12 = vsyncpa [#allocation5], 0  ;;  %s893_s18 = smov [#allocation6]   ;;  %s894_s20 = smov [#allocation3]  }
   0x3   :  { %s30_s19 = sshll.u32 %s893_s18, 4  ;;  %s18_s21 = sshll.u32 %s894_s20, 4  ;;  %s31_s19 = int_to_ptr.vmem [resolvable:$true] %s30_s19  ;;  %s19_s21 = int_to_ptr.vmem [resolvable:$true] %s18_s21 }
   0x4   :  { %s815_s22 = scalar_lea.vmem %s31_s19, 4096  ;;  %p820_p1 = scmp.lt.s32.totalorder %s31_s19, %s31_s19 }
   0x5   :  { %p816_p0 = scmp.ne.s32.totalorder %s31_s19, %s815_s22  ;;  %p821_p2 = scmp.lt.s32.totalorder %s815_s22, %s815_s22 }
   0x7   :  { %p822_p3 = por %p821_p2, %p820_p1 }
   0x9   :  { %p823_p4 = pnand %p822_p3, %p816_p0 }
   0xb   :  { %826 = shalt.err (!%p823_p4)
}
   0xc   :  { %s895_s23 = smov 128   ;;  %s896_s24 = smov 8  }
   0xd   :  { %36 = dma.hbm_to_vmem [thread:$0]  %s950_s1, 4096, %s31_s19, [#allocation7], %s895_s23, %s895_s23, %s896_s24  }
   0xe   :  { %s835_s27 = scalar_lea.vmem %s19_s21, 256  ;;  %p840_p6 = scmp.lt.s32.totalorder %s19_s21, %s19_s21 }
   0xf   :  { %p836_p5 = scmp.ne.s32.totalorder %s19_s21, %s835_s27  ;;  %p841_p7 = scmp.lt.s32.totalorder %s835_s27, %s835_s27 }
  0x11   :  { %p842_p8 = por %p841_p7, %p840_p6 }
  0x13   :  { %p843_p9 = pnand %p842_p8, %p836_p5 }
  0x15   :  { %846 = shalt.err (!%p843_p9)
}
  0x16   :  { %24 = dma.hbm_to_vmem [thread:$0]  %s949_s0, 256, %s19_s21, [#allocation4], %s895_s23, %s895_s23, %s896_s24  }
  0x17   :  { %s897_s30 = smov [#allocation8]  }
  0x18   :  { %s44_s6 = sshll.u32 %s897_s30, 4  ;;  %s45_s6 = int_to_ptr.vmem [resolvable:$true] %s44_s6 }
  0x19   :  { %s855_s7 = scalar_lea.vmem %s45_s6, 4096  ;;  %p860_p11 = scmp.lt.s32.totalorder %s45_s6, %s45_s6 }
  0x1a   :  { %p856_p10 = scmp.ne.s32.totalorder %s45_s6, %s855_s7  ;;  %p861_p12 = scmp.lt.s32.totalorder %s855_s7, %s855_s7 }
  0x1c   :  { %p862_p13 = por %p861_p12, %p860_p11 }
  0x1e   :  { %p863_p0 = pnand %p862_p13, %p856_p10 }
  0x20   :  { %866 = shalt.err (!%p863_p0)
}
  0x21   :  { %50 = dma.hbm_to_vmem [thread:$0]  %s952_s3, 4096, %s45_s6, [#allocation7], %s895_s23, %s895_s23, %s896_s24  }
  0x22   :  { %887 = dma.done.wait [#allocation4], 256  }
  0x23   :  { %888 = vsyncadd [#allocation4], 4294967040 }
  0x24   :  { %889 = dma.done.wait [#allocation7], 8192  }
  0x25   :  { %890 = vsyncadd [#allocation7], 4294959104  ;;  %v708_v0 = vld [vmem:[#allocation6 + $0x74] ss:$8 sps:$4 sm:$0xff]   ;;  %v710_v1 = vld [vmem:[#allocation6 + $0x70] ss:$8 sps:$4 sm:$0xff]  }
  0x26   :  { %312 = vmatprep.subr.bf16.mxu0 %v708_v0  ;;  %v711_v2 = vld [vmem:[#allocation6 + $0x64] ss:$8 sps:$4 sm:$0xff]   ;;  %v713_v3 = vld [vmem:[#allocation6 + $0x60] ss:$8 sps:$4 sm:$0xff]   ;;  %v714_v4 = vld [vmem:[#allocation6 + $0x54] ss:$8 sps:$4 sm:$0xff]  }
  0x27   :  { %313 = vmatpush1.bf16.msra.mxu0 %v710_v1  ;;  %v716_v5 = vld [vmem:[#allocation6 + $0x50] ss:$8 sps:$4 sm:$0xff]   ;;  %v717_v6 = vld [vmem:[#allocation6 + $0x44] ss:$8 sps:$4 sm:$0xff]   ;;  %v719_v7 = vld [vmem:[#allocation6 + $0x40] ss:$8 sps:$4 sm:$0xff]  }
  0x28   :  { %314 = vmatprep.subr.bf16.mxu0 %v711_v2  ;;  %v720_v8 = vld [vmem:[#allocation6 + $0x34] ss:$8 sps:$4 sm:$0xff]   ;;  %v722_v9 = vld [vmem:[#allocation6 + $0x30] ss:$8 sps:$4 sm:$0xff]   ;;  %v723_v10 = vld [vmem:[#allocation6 + $0x24] ss:$8 sps:$4 sm:$0xff]   ;;  %v67_v2 = vlaneseq }
  0x29   :  { %v725_v11 = vld [vmem:[#allocation6 + $0x20] ss:$8 sps:$4 sm:$0xff]   ;;  %v726_v12 = vld [vmem:[#allocation6 + $0x14] ss:$8 sps:$4 sm:$0xff]   ;;  %v728_v13 = vld [vmem:[#allocation6 + $0x10] ss:$8 sps:$4 sm:$0xff]  }
  0x2a   :  { %v729_v14 = vld [vmem:[#allocation6 + $0x4] ss:$8 sps:$4 sm:$0xff]   ;;  %v758_v15 = vld [vmem:[#allocation3 + $0x4] ss:$8 sps:$4 sm:$0xff]   ;;  %v761_v17 = vld [vmem:[#allocation8 + $0x70] ss:$8 sps:$4 sm:$0xff]  }
  0x2b   :  { %315 = vmatpush1.bf16.msra.mxu0 %v713_v3  ;;  %v759_v16 = vld [vmem:[#allocation8 + $0x74] ss:$8 sps:$4 sm:$0xff]   ;;  %344 = vmatprep.mubr.bf16.mxu0 %v758_v15  ;;  %v762_v18 = vld [vmem:[#allocation8 + $0x64] ss:$8 sps:$4 sm:$0xff]   ;;  %v764_v19 = vld [vmem:[#allocation8 + $0x60] ss:$8 sps:$4 sm:$0xff]  }
  0x2c   :  { %316 = vmatprep.subr.bf16.mxu0 %v714_v4  ;;  %557 = vmatprep.subr.bf16.mxu1 %v759_v16  ;;  %v731_v20 = vld [vmem:[#allocation6] ss:$8 sps:$4 sm:$0xff]   ;;  %v765_v21 = vld [vmem:[#allocation8 + $0x54] ss:$8 sps:$4 sm:$0xff]   ;;  %v767_v23 = vld [vmem:[#allocation8 + $0x50] ss:$8 sps:$4 sm:$0xff]  }
  0x2d   :  { %558 = vmatpush1.bf16.msra.mxu1 %v761_v17  ;;  %v732_v22 = vld [vmem:[#allocation6 + $0xf4] ss:$8 sps:$4 sm:$0xff]   ;;  %v734_v24 = vld [vmem:[#allocation6 + $0xf0] ss:$8 sps:$4 sm:$0xff]   ;;  %v768_v25 = vld [vmem:[#allocation8 + $0x44] ss:$8 sps:$4 sm:$0xff]  }
  0x2e   :  { %559 = vmatprep.subr.bf16.mxu1 %v762_v18  ;;  %v735_v26 = vld [vmem:[#allocation6 + $0xe4] ss:$8 sps:$4 sm:$0xff]   ;;  %v770_v27 = vld [vmem:[#allocation8 + $0x40] ss:$8 sps:$4 sm:$0xff]   ;;  %v771_v29 = vld [vmem:[#allocation8 + $0x34] ss:$8 sps:$4 sm:$0xff]  }
  0x2f   :  { %317 = vmatpush1.bf16.msra.mxu0 %v716_v5  ;;  %v737_v28 = vld [vmem:[#allocation6 + $0xe0] ss:$8 sps:$4 sm:$0xff]   ;;  %v738_v30 = vld [vmem:[#allocation6 + $0xd4] ss:$8 sps:$4 sm:$0xff]   ;;  %v773_v31 = vld [vmem:[#allocation8 + $0x30] ss:$8 sps:$4 sm:$0xff]  }
  0x30   :  { %318 = vmatprep.subr.bf16.mxu0 %v717_v6  ;;  %v740_v32 = vld [vmem:[#allocation6 + $0xd0] ss:$8 sps:$4 sm:$0xff]   ;;  %v774_v33 = vld [vmem:[#allocation8 + $0x24] ss:$8 sps:$4 sm:$0xff]   ;;  %v776_v35 = vld [vmem:[#allocation8 + $0x20] ss:$8 sps:$4 sm:$0xff]  }
  0x31   :  { %560 = vmatpush1.bf16.msra.mxu1 %v764_v19  ;;  %v741_v34 = vld [vmem:[#allocation6 + $0xc4] ss:$8 sps:$4 sm:$0xff]   ;;  %v743_v36 = vld [vmem:[#allocation6 + $0xc0] ss:$8 sps:$4 sm:$0xff]   ;;  %v777_v37 = vld [vmem:[#allocation8 + $0x14] ss:$8 sps:$4 sm:$0xff]  }
  0x32   :  { %561 = vmatprep.subr.bf16.mxu1 %v765_v21  ;;  %v744_v38 = vld [vmem:[#allocation6 + $0xb4] ss:$8 sps:$4 sm:$0xff]   ;;  %v779_v39 = vld [vmem:[#allocation8 + $0x10] ss:$8 sps:$4 sm:$0xff]   ;;  %v780_v41 = vld [vmem:[#allocation8 + $0x4] ss:$8 sps:$4 sm:$0xff]  }
  0x33   :  { %319 = vmatpush1.bf16.msra.mxu0 %v719_v7  ;;  %v746_v40 = vld [vmem:[#allocation6 + $0xb0] ss:$8 sps:$4 sm:$0xff]   ;;  %v747_v42 = vld [vmem:[#allocation6 + $0xa4] ss:$8 sps:$4 sm:$0xff]   ;;  %v782_v43 = vld [vmem:[#allocation8] ss:$8 sps:$4 sm:$0xff]  }
  0x34   :  { %320 = vmatprep.subr.bf16.mxu0 %v720_v8  ;;  %v749_v44 = vld [vmem:[#allocation6 + $0xa0] ss:$8 sps:$4 sm:$0xff]   ;;  %v783_v45 = vld [vmem:[#allocation8 + $0xf4] ss:$8 sps:$4 sm:$0xff]   ;;  %v785_v47 = vld [vmem:[#allocation8 + $0xf0] ss:$8 sps:$4 sm:$0xff]  }
  0x35   :  { %562 = vmatpush1.bf16.msra.mxu1 %v767_v23  ;;  %v750_v46 = vld [vmem:[#allocation6 + $0x94] ss:$8 sps:$4 sm:$0xff]   ;;  %v752_v48 = vld [vmem:[#allocation6 + $0x90] ss:$8 sps:$4 sm:$0xff]   ;;  %v786_v49 = vld [vmem:[#allocation8 + $0xe4] ss:$8 sps:$4 sm:$0xff]  }
  0x36   :  { %563 = vmatprep.subr.bf16.mxu1 %v768_v25  ;;  %v753_v50 = vld [vmem:[#allocation6 + $0x84] ss:$8 sps:$4 sm:$0xff]   ;;  %v788_v51 = vld [vmem:[#allocation8 + $0xe0] ss:$8 sps:$4 sm:$0xff]   ;;  %v789_v53 = vld [vmem:[#allocation8 + $0xd4] ss:$8 sps:$4 sm:$0xff]  }
  0x37   :  { %321 = vmatpush1.bf16.msra.mxu0 %v722_v9  ;;  %v755_v52 = vld [vmem:[#allocation6 + $0x80] ss:$8 sps:$4 sm:$0xff]   ;;  %v756_v54 = vld [vmem:[#allocation3] ss:$8 sps:$4 sm:$0xff]   ;;  %v792_v56 = vld [vmem:[#allocation8 + $0xc4] ss:$8 sps:$4 sm:$0xff]  }
  0x38   :  { %322 = vmatprep.subr.bf16.mxu0 %v723_v10  ;;  %v791_v55 = vld [vmem:[#allocation8 + $0xd0] ss:$8 sps:$4 sm:$0xff]   ;;  %v794_v57 = vld [vmem:[#allocation8 + $0xc0] ss:$8 sps:$4 sm:$0xff]   ;;  %v795_v58 = vld [vmem:[#allocation8 + $0xb4] ss:$8 sps:$4 sm:$0xff]  }
  0x39   :  { %564 = vmatpush1.bf16.msra.mxu1 %v770_v27  ;;  %v797_v59 = vld [vmem:[#allocation8 + $0xb0] ss:$8 sps:$4 sm:$0xff]   ;;  %v798_v60 = vld [vmem:[#allocation8 + $0xa4] ss:$8 sps:$4 sm:$0xff]   ;;  %v800_v61 = vld [vmem:[#allocation8 + $0xa0] ss:$8 sps:$4 sm:$0xff]  }
  0x3a   :  { %565 = vmatprep.subr.bf16.mxu1 %v771_v29  ;;  %v801_v62 = vld [vmem:[#allocation8 + $0x94] ss:$8 sps:$4 sm:$0xff]   ;;  %v803_v63 = vld [vmem:[#allocation8 + $0x90] ss:$8 sps:$4 sm:$0xff]   ;;  %v804_v0 = vld [vmem:[#allocation8 + $0x84] ss:$8 sps:$4 sm:$0xff]  }
  0x3b   :  { %323 = vmatpush1.bf16.msra.mxu0 %v725_v11  ;;  %v806_v1 = vld [vmem:[#allocation8 + $0x80] ss:$8 sps:$4 sm:$0xff]   ;;  %v68_v3 = vshrl.u32 %v67_v2, 7  ;;  %v121_v4 = vld [vmem:[%s951_s2] sm:$0x3]  ;;  %s898_s10 = smov [#allocation9]  }
  0x3c   :  { %324 = vmatprep.subr.bf16.mxu0 %v726_v12  ;;  %v122_v7 = vunpack.c.l.bf16 %v121_v4  ;;  %s621_s11 = sshll.u32 %s898_s10, 4  ;;  %s622_s11 = int_to_ptr.vmem [resolvable:$true] %s621_s11 }
  0x3d   :  { %566 = vmatpush1.bf16.msra.mxu1 %v773_v31  ;;  %v73_v5 = vsub.s32 2, %v68_v3  ;;  %v69_v6 = vsub.s32 0, %v68_v3  ;;  %p872_p2 = scmp.lt.s32.totalorder %s622_s11, %s622_s11 }
  0x3e   :  { %567 = vmatprep.subr.bf16.mxu1 %v774_v33 }
  0x3f   :  { %325 = vmatpush1.bf16.msra.mxu0 %v728_v13  ;;  %v131_v8 = vrot.slane %v122_v7, %v73_v5  ;;  %v127_v9 = vrot.slane %v122_v7, %v69_v6 }
  0x40   :  { %326 = vmatprep.subr.bf16.mxu0 %v729_v14 }
  0x41   :  { %568 = vmatpush1.bf16.msra.mxu1 %v776_v35  ;;  %v141_v11 = vrot.slane %v131_v8, %v69_v6  ;;  %v137_v12 = vrot.slane %v127_v9, %v69_v6 }
  0x42   :  { %569 = vmatprep.subr.bf16.mxu1 %v777_v37 }
  0x43   :  { %327 = vmatpush1.bf16.msra.mxu0 %v731_v20 }
  0x44   :  { %328 = vmatprep.subr.bf16.mxu0 %v732_v22 }
  0x45   :  { %570 = vmatpush1.bf16.msra.mxu1 %v779_v39 }
  0x46   :  { %571 = vmatprep.subr.bf16.mxu1 %v780_v41 }
  0x47   :  { %329 = vmatpush2.bf16.msra.mxu0 %v734_v24 }
  0x48   :  { %330 = vmatprep.subr.bf16.mxu0 %v735_v26  ;;  %v64_v26 = vld [vmem:[%s953_s4] sm:$0x3]  ;;  %s867_s4 = scalar_lea.vmem %s622_s11, 512 }
  0x49   :  { %572 = vmatpush1.bf16.msra.mxu1 %v782_v43  ;;  %v65_v27 = vunpack.c.l.bf16 %v64_v26  ;;  %p868_p1 = scmp.ne.s32.totalorder %s622_s11, %s867_s4  ;;  %p873_p3 = scmp.lt.s32.totalorder %s867_s4, %s867_s4 }
  0x4a   :  { %573 = vmatprep.subr.bf16.mxu1 %v783_v45 }
  0x4b   :  { %331 = vmatpush2.bf16.msra.mxu0 %v737_v28  ;;  %v70_v28 = vrot.slane %v65_v27, %v69_v6  ;;  %v74_v29 = vrot.slane %v65_v27, %v73_v5  ;;  %p874_p4 = por %p873_p3, %p872_p2 }
  0x4c   :  { %332 = vmatprep.subr.bf16.mxu0 %v738_v30 }
  0x4d   :  { %574 = vmatpush2.bf16.msra.mxu1 %v785_v47  ;;  %v80_v30 = vrot.slane %v70_v28, %v69_v6  ;;  %v84_v31 = vrot.slane %v74_v29, %v69_v6  ;;  %p875_p5 = pnand %p874_p4, %p868_p1 }
  0x4e   :  { %575 = vmatprep.subr.bf16.mxu1 %v786_v49 }
  0x4f   :  { %333 = vmatpush2.bf16.msra.mxu0 %v740_v32 }
  0x50   :  { %334 = vmatprep.subr.bf16.mxu0 %v741_v34 }
  0x51   :  { %576 = vmatpush2.bf16.msra.mxu1 %v788_v51 }
  0x52   :  { %577 = vmatprep.subr.bf16.mxu1 %v789_v53 }
  0x53   :  { %335 = vmatpush2.bf16.msra.mxu0 %v743_v36 }
  0x54   :  { %336 = vmatprep.subr.bf16.mxu0 %v744_v38 }
  0x55   :  { %578 = vmatpush2.bf16.msra.mxu1 %v791_v55 }
  0x56   :  { %579 = vmatprep.subr.bf16.mxu1 %v792_v56 }
  0x57   :  { %337 = vmatpush2.bf16.msra.mxu0 %v746_v40 }
  0x58   :  { %338 = vmatprep.subr.bf16.mxu0 %v747_v42 }
  0x59   :  { %580 = vmatpush2.bf16.msra.mxu1 %v794_v57 }
  0x5a   :  { %581 = vmatprep.subr.bf16.mxu1 %v795_v58 }
  0x5b   :  { %339 = vmatpush2.bf16.msra.mxu0 %v749_v44 }
  0x5c   :  { %340 = vmatprep.subr.bf16.mxu0 %v750_v46 }
  0x5d   :  { %582 = vmatpush2.bf16.msra.mxu1 %v797_v59 }
  0x5e   :  { %583 = vmatprep.subr.bf16.mxu1 %v798_v60 }
  0x5f   :  { %341 = vmatpush2.bf16.msra.mxu0 %v752_v48 }
  0x60   :  { %342 = vmatprep.subr.bf16.mxu0 %v753_v50 }
  0x61   :  { %584 = vmatpush2.bf16.msra.mxu1 %v800_v61 }
  0x62   :  { %585 = vmatprep.subr.bf16.mxu1 %v801_v62 }
  0x63   :  { %343 = vmatpush2.bf16.msra.mxu0 %v755_v52 }
  0x65   :  { %586 = vmatpush2.bf16.msra.mxu1 %v803_v63 }
  0x66   :  { %345 = vmatmul.mubr.bf16.vlgmr.msra.gmra.mxu0 %v756_v54  ;;  %587 = vmatprep.subr.bf16.mxu1 %v804_v0 }
  0x69   :  { %588 = vmatpush2.bf16.msra.mxu1 %v806_v1 }
 0x126   :  { %v346_v10 = vpop.f32.mrf.mxu0 }
 0x127   :  { %v347_v17 = vadd.f32 %v346_v10, %v137_v12 }
 0x128   :  { %v348_v13 = vpop.f32.mrf.mxu0 }
 0x129   :  { %v349_v15 = vadd.f32 %v348_v13, %v141_v11  ;;  %v355_v23 = vmax.f32 %v347_v17, 0.0 }
 0x12a   :  { %v350_v14 = vpop.f32.mrf.mxu0 }
 0x12b   :  { %v351_v16 = vadd.f32 %v350_v14, %v137_v12  ;;  %v356_v21 = vmax.f32 %v349_v15, 0.0 }
 0x12c   :  { %v352_v18 = vpop.f32.mrf.mxu0 }
 0x12d   :  { %v353_v19 = vadd.f32 %v352_v18, %v141_v11  ;;  %v357_v20 = vmax.f32 %v351_v16, 0.0 }
 0x12f   :  { %v358_v22 = vmax.f32 %v353_v19, 0.0  ;;  %v363_v25 = vpack.c.bf16 %v357_v20, %v355_v23 }
 0x131   :  { %v364_v24 = vpack.c.bf16 %v358_v22, %v356_v21 }
 0x133   :  { %589 = vmatprep.mubr.bf16.mxu1 %v364_v24 }
 0x134   :  { %590 = vmatmul.mubr.bf16.vlgmr.msra.gmra.mxu1 %v363_v25 }
 0x1f4   :  { %v591_v32 = vpop.f32.mrf.mxu1 }
 0x1f5   :  { %v600_v33 = vadd.f32 %v591_v32, %v80_v30 }
 0x1f6   :  { %v593_v34 = vpop.f32.mrf.mxu1 }
 0x1f7   :  { %612 = vst [vmem:[#allocation9] sm:$0xff] %v600_v33  ;;  %v601_v35 = vadd.f32 %v593_v34, %v84_v31 }
 0x1f8   :  { %v595_v36 = vpop.f32.mrf.mxu1 }
 0x1f9   :  { %613 = vst [vmem:[#allocation9 + $0x8] sm:$0xff] %v601_v35  ;;  %v602_v37 = vadd.f32 %v595_v36, %v80_v30 }
 0x1fa   :  { %v597_v38 = vpop.f32.mrf.mxu1 }
 0x1fb   :  { %614 = vst [vmem:[#allocation9 + $0x10] sm:$0xff] %v602_v37  ;;  %v603_v39 = vadd.f32 %v597_v38, %v84_v31 }
 0x1fd   :  { %615 = vst [vmem:[#allocation9 + $0x18] sm:$0xff] %v603_v39 }
 0x1fe   :  { %878 = shalt.err (!%p875_p5)
}
 0x1ff   :  { %s899_s12 = smov 256   ;;  %s900_s13 = smov 16  }
 0x200   :  { %627 = dma.vmem_to_hbm [thread:$0]  %s622_s11, 512, %s954_s5, [#allocation5], %s899_s12, %s899_s12, %s900_s13  }
 0x201   :  { %891 = dma.done.wait [#allocation5], 512  }
 0x202   :  { %892 = vsyncadd [#allocation5], 4294966784 }
 0x203   :  { %631 = vsyncpa [#allocation4], 1 }
 0x204   :  { %632 = vsyncpa [#allocation7], 1 }
 0x205   :  { %633 = vsyncpa [#allocation5], 1 }

</bundles_post_ra>
